<compile_context>
chip_gen: v6e
topology: v6e:2x2x1
jax: 0.10.0
libtpu: 0.0.40
codegen_flags: <defaults>
</compile_context>

<pallas_src>
import jax
import jax.numpy as jnp
from jax.experimental import pallas as pl
from jax.experimental.pallas import tpu as pltpu


# ----------------------------- config (synthetic) ---------------------------
MAX_INPUT_LENGTH = 128        # config['tokenizer']['max_input_length'] (lane-dense)
PAD_ID = 50259                # tokenizer.pad_token_id after add_special_tokens
VOCAB_SIZE = 50260
DEFAULT_BLOCK_BATCH = 512     # big streaming tile (review: >=512 rows ~ 85% roofline)
_ROW_ALIGN = 32               # lcm of int8/int16/int32 sublane tiling
_BIG = 1 << 30                # "no match" sentinel for the min-reduction


def _round_up(x, m):
    return ((x + m - 1) // m) * m


# --------------------------------- kernel -----------------------------------
def _encode_feature_kernel(ids_ref, off_s_ref, off_e_ref, se_ref,   # inputs
                           mask_ref, pos_ref):                      # outputs
    ids = ids_ref[...]                                   # [TB, L] int32
    off_s = off_s_ref[...].astype(jnp.int32)             # [TB, L] (int16 ok -> upcast)
    off_e = off_e_ref[...].astype(jnp.int32)

    # 1) attention mask: 1 where not PAD, else 0 (stored at the output dtype,
    #    int8 by default -> 4x fewer HBM bytes than int32)
    mask_ref[...] = (ids != PAD_ID).astype(mask_ref.dtype)

    TB, L = ids.shape

    # --- hoisted work shared by both char_to_token reductions ---
    tok_idx = jax.lax.broadcasted_iota(jnp.int32, (TB, L), 1)
    span_valid = off_e > off_s            # pad/special tokens have the (0, 0) span

    # 2) per-row char indices: lane 0 = start_idx, lane 1 = end_idx
    s_col = se_ref[:, 0:1]                # [TB, 1] int32
    e_col = se_ref[:, 1:2]

    def char_to_token(col):
        # token t matches iff off_s[t] <= c < off_e[t]; no match -> max_input_length
        valid = span_valid & (off_s <= col) & (col < off_e)
        pos = jnp.min(jnp.where(valid, tok_idx, _BIG), axis=1, keepdims=True)
        return jnp.where(pos >= _BIG, jnp.int32(MAX_INPUT_LENGTH), pos)

    # 3) compact positions output: [TB, 2] (col 0 = start, col 1 = end)
    pos_ref[:, 0:1] = char_to_token(s_col)
    pos_ref[:, 1:2] = char_to_token(e_col)


# --------------------------------- wrapper ----------------------------------
def gpt2_encode_feature(input_ids, offset_start, offset_end, start_idx, end_idx,
                        *, block_batch=DEFAULT_BLOCK_BATCH,
                        mask_dtype=jnp.int8, core_parallel=False):
    """Numeric part of Gpt2_Encode_Feature.forward.

    Args:
      input_ids                : [B, L] int32 token ids (cast only if needed)
      offset_start, offset_end : [B, L] integer char-offset spans (int16 or int32)
      start_idx, end_idx       : [B] integer character indices
      block_batch              : batch-tile height (rounded to 32)
      mask_dtype               : dtype of attention_mask output (int8 default)
      core_parallel            : shard the batch grid axis across TensorCores (v7x)
    Returns:
      attention_mask [B, L] mask_dtype, start_positions [B] int32, end_positions [B] int32
    """
    B, L = input_ids.shape

    if input_ids.dtype != jnp.int32:
        input_ids = input_ids.astype(jnp.int32)
    # offsets: accepted in any integer dtype (int16 halves their HBM traffic);
    # upcast happens in-register inside the kernel, no wrapper pass.

    # lane-packed start/end indices: tiny [B, 2] int32 array
    se = jnp.stack([start_idx.astype(jnp.int32), end_idx.astype(jnp.int32)], axis=1)

    TB = min(_round_up(block_batch, _ROW_ALIGN), _round_up(B, _ROW_ALIGN))
    Bp = _round_up(B, TB)
    if Bp != B:   # only for ragged batches; at most TB-1 extra rows
        pad = Bp - B
        input_ids = jnp.pad(input_ids, ((0, pad), (0, 0)), constant_values=PAD_ID)
        offset_start = jnp.pad(offset_start, ((0, pad), (0, 0)))
        offset_end = jnp.pad(offset_end, ((0, pad), (0, 0)))
        se = jnp.pad(se, ((0, pad), (0, 0)))

    seq_spec = pl.BlockSpec((TB, L), lambda i: (i, 0))
    se_spec = pl.BlockSpec((TB, 2), lambda i: (i, 0))

    # Double-buffered VMEM footprint; only raise the scoped limit (v5e default
    # is 16 MiB) if a caller picks a block_batch big enough to need it.
    blk_bytes = 2 * TB * (
        L * (4 + offset_start.dtype.itemsize + offset_end.dtype.itemsize
             + jnp.dtype(mask_dtype).itemsize) + 16)
    cparams = {"dimension_semantics":
               (pltpu.CORE_PARALLEL if core_parallel else "parallel",)}
    if blk_bytes > 12 * 1024 * 1024:
        cparams["vmem_limit_bytes"] = min(2 * blk_bytes, 96 * 1024 * 1024)

    mask, pos = pl.pallas_call(
        _encode_feature_kernel,
        out_shape=(jax.ShapeDtypeStruct((Bp, L), mask_dtype),   # attention_mask
                   jax.ShapeDtypeStruct((Bp, 2), jnp.int32)),   # packed positions
        grid=(Bp // TB,),
        in_specs=[seq_spec, seq_spec, seq_spec, se_spec],
        out_specs=[seq_spec, se_spec],
        compiler_params=pltpu.CompilerParams(**cparams),
    )(input_ids, offset_start, offset_end, se)

    attention_mask = mask[:B]
    start_positions = pos[:B, 0]
    end_positions = pos[:B, 1]
    return attention_mask, start_positions, end_positions


# ------------------------- synthetic "tokenization" -------------------------
def make_synthetic_encoding(key, batch, max_len):
    """Deterministically build what a HF fast tokenizer would return:
    input_ids, char-offset spans per token (int16), and real sequence lengths."""
    k_ids, k_len, k_span = jax.random.split(key, 3)

    seq_lens = jax.random.randint(k_len, (batch,), max_len // 4, max_len // 2)

    ids = jax.random.randint(k_ids, (batch, max_len), 0, VOCAB_SIZE - 4)
    pos = jnp.arange(max_len)[None, :]
    in_range = pos < seq_lens[:, None]
    ids = jnp.where(in_range, ids, PAD_ID).astype(jnp.int32)

    span_len = jax.random.randint(k_span, (batch, max_len), 1, 7)
    off_end = jnp.cumsum(span_len, axis=1)
    off_start = off_end - span_len
    off_start = jnp.where(in_range, off_start, 0).astype(jnp.int16)   # fits easily
    off_end = jnp.where(in_range, off_end, 0).astype(jnp.int16)
    return ids, off_start, off_end, seq_lens


# ------------------------------ reference & main -----------------------------
def _ref_char_to_token(off_s, off_e, c):
    off_s = off_s.astype(jnp.int32)
    off_e = off_e.astype(jnp.int32)
    c = c.astype(jnp.int32)[:, None]
    valid = (off_s <= c) & (c < off_e) & (off_e > off_s)
    cand = jnp.where(valid, jnp.arange(off_s.shape[1])[None, :], _BIG)
    p = cand.min(axis=1)
    return jnp.where(p >= _BIG, MAX_INPUT_LENGTH, p).astype(jnp.int32)


def _run_case(key, batch, **kwargs):
    ids, off_s, off_e, _ = make_synthetic_encoding(key, batch, MAX_INPUT_LENGTH)

    total_chars = off_e.max(axis=1).astype(jnp.int32)
    start_idx = (total_chars // 3).astype(jnp.int32)       # always maps to a token
    end_idx = (total_chars // 2).astype(jnp.int32)
    # force the max_input_length fallback branch on the last example's end index
    end_idx = end_idx.at[-1].set(total_chars[-1] + 1000)

    mask, spos, epos = jax.block_until_ready(
        gpt2_encode_feature(ids, off_s, off_e, start_idx, end_idx, **kwargs))

    ref_mask = (ids != PAD_ID).astype(jnp.int32)
    assert jnp.array_equal(mask.astype(jnp.int32), ref_mask)
    assert jnp.array_equal(spos, _ref_char_to_token(off_s, off_e, start_idx))
    assert jnp.array_equal(epos, _ref_char_to_token(off_s, off_e, end_idx))
    assert int(epos[-1]) == MAX_INPUT_LENGTH               # fallback exercised


if __name__ == "__main__":
    key = jax.random.PRNGKey(0)
    k1, k2, k3 = jax.random.split(key, 3)
    _run_case(k1, 2)                      # tiny batch from the spec (padded single block)
    _run_case(k2, 64)                     # one large streaming block, no padding
    _run_case(k3, 64, block_batch=32)     # grid=(2,): exercises the pipelined path
    print("KERNEL_OK")
</pallas_src>

<mosaic_0001>
module attributes {stable_mosaic.version = 11 : i64} {
  func.func @_encode_feature_kernel(%arg0: i32, %arg1: memref<32x128xi32, #tpu.memory_space<vmem>>, %arg2: memref<32x128xi16, #tpu.memory_space<vmem>>, %arg3: memref<32x128xi16, #tpu.memory_space<vmem>>, %arg4: memref<32x2xi32, #tpu.memory_space<vmem>>, %arg5: memref<32x128xi8, #tpu.memory_space<vmem>>, %arg6: memref<32x2xi32, #tpu.memory_space<vmem>>) attributes {dimension_semantics = [#tpu.dimension_semantics<parallel>], iteration_bounds = array<i64: 1>, scalar_prefetch = 0 : i64, scratch_operands = 0 : i64, tpu.core_type = #tpu.core_type<tc>, window_params = [{transform_indices = @transform_0, window_bounds = array<i64: 32, 128>}, {transform_indices = @transform_1, window_bounds = array<i64: 32, 128>}, {transform_indices = @transform_2, window_bounds = array<i64: 32, 128>}, {transform_indices = @transform_3, window_bounds = array<i64: 32, 2>}, {transform_indices = @transform_4, window_bounds = array<i64: 32, 128>}, {transform_indices = @transform_5, window_bounds = array<i64: 32, 2>}]} {
    %c0 = arith.constant 0 : index
    %c0_0 = arith.constant 0 : index
    %0 = vector.load %arg1[%c0, %c0_0] : memref<32x128xi32, #tpu.memory_space<vmem>>, vector<32x128xi32>
    %c0_1 = arith.constant 0 : index
    %c0_2 = arith.constant 0 : index
    %1 = vector.load %arg2[%c0_1, %c0_2] : memref<32x128xi16, #tpu.memory_space<vmem>>, vector<32x128xi16>
    %2 = arith.extsi %1 : vector<32x128xi16> to vector<32x128xi32>
    %c0_3 = arith.constant 0 : index
    %c0_4 = arith.constant 0 : index
    %3 = vector.load %arg3[%c0_3, %c0_4] : memref<32x128xi16, #tpu.memory_space<vmem>>, vector<32x128xi16>
    %4 = arith.extsi %3 : vector<32x128xi16> to vector<32x128xi32>
    %c50259_i32 = arith.constant 50259 : i32
    %5 = vector.broadcast %c50259_i32 : i32 to vector<32x128xi32>
    %6 = arith.cmpi ne, %0, %5 : vector<32x128xi32>
    %7 = arith.extui %6 : vector<32x128xi1> to vector<32x128xi8>
    %c0_5 = arith.constant 0 : index
    %c0_6 = arith.constant 0 : index
    %8 = vector.load %arg5[%c0_5, %c0_6] : memref<32x128xi8, #tpu.memory_space<vmem>>, vector<32x128xi8>
    tpu.vector_store %arg5[%c0_5, %c0_6], %7 {strides = array<i32>} : memref<32x128xi8, #tpu.memory_space<vmem>>, vector<32x128xi8>,
    %9 = tpu.iota {dimensions = array<i32: 1>} : vector<32x128xi32>
    %10 = arith.cmpi sgt, %4, %2 : vector<32x128xi32>
    %c0_7 = arith.constant 0 : index
    %c0_8 = arith.constant 0 : index
    %11 = vector.load %arg4[%c0_7, %c0_8] : memref<32x2xi32, #tpu.memory_space<vmem>>, vector<32x1xi32>
    %c0_9 = arith.constant 0 : index
    %c1 = arith.constant 1 : index
    %12 = vector.load %arg4[%c0_9, %c1] : memref<32x2xi32, #tpu.memory_space<vmem>>, vector<32x1xi32>
    %13 = vector.broadcast %11 : vector<32x1xi32> to vector<32x128xi32>
    %14 = arith.cmpi sle, %2, %13 : vector<32x128xi32>
    %15 = arith.andi %10, %14 : vector<32x128xi1>
    %16 = vector.broadcast %11 : vector<32x1xi32> to vector<32x128xi32>
    %17 = arith.cmpi slt, %16, %4 : vector<32x128xi32>
    %18 = arith.andi %15, %17 : vector<32x128xi1>
    %c1073741824_i32 = arith.constant 1073741824 : i32
    %19 = vector.broadcast %c1073741824_i32 : i32 to vector<32x128xi32>
    %20 = arith.select %18, %9, %19 : vector<32x128xi1>, vector<32x128xi32>
    %cst = arith.constant dense<2147483647> : vector<32xi32>
    %21 = vector.multi_reduction <minsi>, %20, %cst [1] : vector<32x128xi32> to vector<32xi32>
    %22 = vector.shape_cast %21 : vector<32xi32> to vector<32x1xi32>
    %c1073741824_i32_10 = arith.constant 1073741824 : i32
    %23 = vector.broadcast %c1073741824_i32_10 : i32 to vector<32x1xi32>
    %24 = arith.cmpi sge, %22, %23 : vector<32x1xi32>
    %c128_i32 = arith.constant 128 : i32
    %25 = vector.broadcast %c128_i32 : i32 to vector<32x1xi32>
    %26 = arith.select %24, %25, %22 : vector<32x1xi1>, vector<32x1xi32>
    %c0_11 = arith.constant 0 : index
    %c0_12 = arith.constant 0 : index
    %27 = vector.load %arg6[%c0_11, %c0_12] : memref<32x2xi32, #tpu.memory_space<vmem>>, vector<32x1xi32>
    tpu.vector_store %arg6[%c0_11, %c0_12], %26 {strides = array<i32>} : memref<32x2xi32, #tpu.memory_space<vmem>>, vector<32x1xi32>,
    %28 = vector.broadcast %12 : vector<32x1xi32> to vector<32x128xi32>
    %29 = arith.cmpi sle, %2, %28 : vector<32x128xi32>
    %30 = arith.andi %10, %29 : vector<32x128xi1>
    %31 = vector.broadcast %12 : vector<32x1xi32> to vector<32x128xi32>
    %32 = arith.cmpi slt, %31, %4 : vector<32x128xi32>
    %33 = arith.andi %30, %32 : vector<32x128xi1>
    %c1073741824_i32_13 = arith.constant 1073741824 : i32
    %34 = vector.broadcast %c1073741824_i32_13 : i32 to vector<32x128xi32>
    %35 = arith.select %33, %9, %34 : vector<32x128xi1>, vector<32x128xi32>
    %cst_14 = arith.constant dense<2147483647> : vector<32xi32>
    %36 = vector.multi_reduction <minsi>, %35, %cst_14 [1] : vector<32x128xi32> to vector<32xi32>
    %37 = vector.shape_cast %36 : vector<32xi32> to vector<32x1xi32>
    %c1073741824_i32_15 = arith.constant 1073741824 : i32
    %38 = vector.broadcast %c1073741824_i32_15 : i32 to vector<32x1xi32>
    %39 = arith.cmpi sge, %37, %38 : vector<32x1xi32>
    %c128_i32_16 = arith.constant 128 : i32
    %40 = vector.broadcast %c128_i32_16 : i32 to vector<32x1xi32>
    %41 = arith.select %39, %40, %37 : vector<32x1xi1>, vector<32x1xi32>
    %c0_17 = arith.constant 0 : index
    %c1_18 = arith.constant 1 : index
    %42 = vector.load %arg6[%c0_17, %c1_18] : memref<32x2xi32, #tpu.memory_space<vmem>>, vector<32x1xi32>
    tpu.vector_store %arg6[%c0_17, %c1_18], %41 {strides = array<i32>} : memref<32x2xi32, #tpu.memory_space<vmem>>, vector<32x1xi32>,
    return
  }
  func.func @transform_0(%arg0: i32) -> (i32, i32) {
    %c0_i32 = arith.constant 0 : i32
    %c0_i32_0 = arith.constant 0 : i32
    return %arg0, %c0_i32 : i32, i32
  }
  func.func @transform_1(%arg0: i32) -> (i32, i32) {
    %c0_i32 = arith.constant 0 : i32
    %c0_i32_0 = arith.constant 0 : i32
    return %arg0, %c0_i32 : i32, i32
  }
  func.func @transform_2(%arg0: i32) -> (i32, i32) {
    %c0_i32 = arith.constant 0 : i32
    %c0_i32_0 = arith.constant 0 : i32
    return %arg0, %c0_i32 : i32, i32
  }
  func.func @transform_3(%arg0: i32) -> (i32, i32) {
    %c0_i32 = arith.constant 0 : i32
    %c0_i32_0 = arith.constant 0 : i32
    return %arg0, %c0_i32 : i32, i32
  }
  func.func @transform_4(%arg0: i32) -> (i32, i32) {
    %c0_i32 = arith.constant 0 : i32
    %c0_i32_0 = arith.constant 0 : i32
    return %arg0, %c0_i32 : i32, i32
  }
  func.func @transform_5(%arg0: i32) -> (i32, i32) {
    %c0_i32 = arith.constant 0 : i32
    %c0_i32_0 = arith.constant 0 : i32
    return %arg0, %c0_i32 : i32, i32
  }
}

</mosaic_0001>

<bundles_post_ra>
// kernel: tpu_custom_call.1
= control target key start
LH: loop header
LB: loop body
LE: loop exit
PB: predicated region body
PF: predicated region fallthrough
CT: control target
= control target key end

     0   :  { %11 = vsyncpa [#allocation3], 0  ;;  %s575_s0 = inlined_call_operand.vmem [shape: s32[32,128], index: 0, kind: input, shape index: {}]   ;;  %s576_s1 = inlined_call_operand.hbm [shape: s16[32,128], index: 1, kind: input, shape index: {}]   ;;  %s577_s2 = inlined_call_operand.hbm [shape: s16[32,128], index: 2, kind: input, shape index: {}]   ;;  %s578_s3 = inlined_call_operand.vmem [shape: s32[32,2], index: 3, kind: input, shape index: {}]   ;;  %s579_s4 = inlined_call_operand.hbm [shape: s8[32,128], index: 4, kind: output, shape index: {0}]   ;;  %s580_s5 = inlined_call_operand.vmem [shape: s32[32,2], index: 5, kind: output, shape index: {1}]  }
   0x1   :  { %12 = vsyncpa [#allocation6], 0 }
   0x2   :  { %13 = vsyncpa [#allocation4], 0  ;;  %s406_s18 = smov [#allocation2]  }
   0x3   :  { %s21_s19 = sshll.u32 %s406_s18, 4  ;;  %s22_s19 = int_to_ptr.vmem [resolvable:$true] %s21_s19 }
   0x4   :  { %s348_s20 = scalar_lea.vmem %s22_s19, 256  ;;  %p353_p1 = scmp.lt.s32.totalorder %s22_s19, %s22_s19 }
   0x5   :  { %p349_p0 = scmp.ne.s32.totalorder %s22_s19, %s348_s20  ;;  %p354_p2 = scmp.lt.s32.totalorder %s348_s20, %s348_s20 }
   0x7   :  { %p355_p3 = por %p354_p2, %p353_p1 }
   0x9   :  { %p356_p4 = pnand %p355_p3, %p349_p0 }
   0xb   :  { %359 = shalt.err (!%p356_p4)
}
   0xc   :  { %s407_s21 = smov 64   ;;  %s408_s22 = smov 4  }
   0xd   :  { %27 = dma.hbm_to_vmem [thread:$0]  %s576_s1, 256, %s22_s19, [#allocation3], %s407_s21, %s407_s21, %s408_s22  }
   0xe   :  { %s409_s25 = smov [#allocation5]  }
   0xf   :  { %s33_s26 = sshll.u32 %s409_s25, 4  ;;  %s34_s26 = int_to_ptr.vmem [resolvable:$true] %s33_s26 }
  0x10   :  { %s368_s27 = scalar_lea.vmem %s34_s26, 256  ;;  %p373_p6 = scmp.lt.s32.totalorder %s34_s26, %s34_s26 }
  0x11   :  { %p369_p5 = scmp.ne.s32.totalorder %s34_s26, %s368_s27  ;;  %p374_p7 = scmp.lt.s32.totalorder %s368_s27, %s368_s27 }
  0x13   :  { %p375_p8 = por %p374_p7, %p373_p6 }
  0x15   :  { %p376_p9 = pnand %p375_p8, %p369_p5 }
  0x17   :  { %379 = shalt.err (!%p376_p9)
}
  0x18   :  { %39 = dma.hbm_to_vmem [thread:$0]  %s577_s2, 256, %s34_s26, [#allocation6], %s407_s21, %s407_s21, %s408_s22  }
  0x19   :  { %400 = dma.done.wait [#allocation3], 256  }
  0x1a   :  { %401 = vsyncadd [#allocation3], 4294967040 }
  0x1b   :  { %402 = dma.done.wait [#allocation6], 256  }
  0x1c   :  { %403 = vsyncadd [#allocation6], 4294967040  ;;  %v410_v0 = vmov 0   ;;  %v87_v1 = vld [vmem:[%s578_s3 + $0x10] sm:$0xff]  ;;  %v85_v2 = vld [vmem:[%s578_s3] sm:$0xff]  ;;  %v411_v5 = vmov 1   ;;  %v79_v14 = vlaneseq }
  0x1d   :  { %337 = vset.pattern.permute.xlu1 %v410_v0  ;;  %336 = vset.pattern.permute.xlu0 %v410_v0  ;;  %v88_v3 = vld [vmem:[%s578_s3 + $0x18] sm:$0xff]  ;;  %v86_v4 = vld [vmem:[%s578_s3 + $0x8] sm:$0xff]  ;;  %v312_v8 = vld [vmem:[#allocation2] sm:$0xff]   ;;  %s412_s18 = smov [#allocation7]  }
  0x1e   :  { %96 = vperm.xlu1 %337, %v87_v1   ;;  %90 = vperm.xlu0 %336, %v85_v2   ;;  %v327_v6 = vld [vmem:[#allocation2 + $0x8] sm:$0xff]   ;;  %v328_v7 = vld [vmem:[#allocation5 + $0x8] sm:$0xff]   ;;  %v320_v9 = vld [vmem:[#allocation5] sm:$0xff]   ;;  %v313_v12 = vunpack.c.l.b16 %v312_v8  ;;  %v314_v19 = vunpack.c.h.b16 %v312_v8  ;;  %v80_v21 = vand.u32 127, %v79_v14  ;;  %s297_s19 = sshll.u32 %s412_s18, 4  ;;  %s298_s19 = int_to_ptr.vmem [resolvable:$true] %s297_s19 }
  0x1f   :  { %v317_v10 = vunpack.c.l.b16 %v327_v6  ;;  %v463_v11 = vunpack.c.l.b16 %v328_v7  ;;  %v321_v13 = vunpack.c.l.b16 %v320_v9  ;;  %v318_v15 = vunpack.c.h.b16 %v327_v6  ;;  %v50_v22 = vld [vmem:[%s575_s0] sm:$0xff]  ;;  %s380_s20 = scalar_lea.vmem %s298_s19, 128  ;;  %p385_p11 = scmp.lt.s32.totalorder %s298_s19, %s298_s19 }
  0x20   :  { %v466_v16 = vunpack.c.h.b16 %v328_v7  ;;  %v322_v20 = vunpack.c.h.b16 %v320_v9  ;;  %p381_p10 = scmp.ne.s32.totalorder %s298_s19, %s380_s20  ;;  %p386_p12 = scmp.lt.s32.totalorder %s380_s20, %s380_s20 }
  0x21   :  { %vm581_vm0 = vcmp.gt.s32.totalorder %v463_v11, %v317_v10  ;;  %vm582_vm3 = vcmp.gt.s32.totalorder %v321_v13, %v313_v12 }
  0x22   :  { %99 = vperm.xlu1 %337, %v88_v3   ;;  %93 = vperm.xlu0 %336, %v86_v4   ;;  %vm84_vm8 = vcmp.gt.s32.totalorder %v466_v16, %v318_v15  ;;  %vm82_vm13 = vcmp.gt.s32.totalorder %v322_v20, %v314_v19  ;;  %p387_p13 = por %p386_p12, %p385_p11 }
  0x24   :  { %p388_p0 = pnand %p387_p13, %p381_p10 }
  0x26   :  { %339 = vset.pattern.permute.xlu1 %v411_v5  ;;  %338 = vset.pattern.permute.xlu0 %v411_v5 }
  0x27   :  { %194 = vperm.xlu1 %339, %v86_v4   ;;  %191 = vperm.xlu0 %338, %v85_v2  }
  0x2b   :  { %197 = vperm.xlu1 %339, %v87_v1   ;;  %200 = vperm.xlu0 %338, %v88_v3  }
  0x99   :  { %v97_v17 = vpop.permute.xlu1 %96  ;;  %v91_v18 = vpop.permute.xlu0 %90 }
  0x9a   :  { %vm103_vm1 = vcmp.le.s32.totalorder %v317_v10, %v97_v17  ;;  %vm111_vm2 = vcmp.lt.s32.totalorder %v97_v17, %v463_v11  ;;  %vm101_vm4 = vcmp.le.s32.totalorder %v313_v12, %v91_v18  ;;  %vm109_vm6 = vcmp.lt.s32.totalorder %v91_v18, %v321_v13 }
  0x9b   :  { %vm107_vm5 = vmand %vm581_vm0, %vm103_vm1 }
  0x9c   :  { %vm471_vm7 = vmand %vm107_vm5, %vm111_vm2 }
  0x9d   :  { %vm105_vm9 = vmand %vm582_vm3, %vm101_vm4  ;;  %v100_v23 = vpop.permute.xlu1 %99  ;;  %v94_v24 = vpop.permute.xlu0 %93  ;;  %v119_v34 = vsel %vm471_vm7, %v80_v21, 1073741824 }
  0x9e   :  { %vm113_vm10 = vmand %vm105_vm9, %vm109_vm6  ;;  %vm104_vm11 = vcmp.le.s32.totalorder %v318_v15, %v100_v23  ;;  %vm112_vm12 = vcmp.lt.s32.totalorder %v100_v23, %v466_v16  ;;  %vm102_vm14 = vcmp.le.s32.totalorder %v314_v19, %v94_v24  ;;  %vm110_vm1 = vcmp.lt.s32.totalorder %v94_v24, %v322_v20  ;;  %v51_v23 = vld [vmem:[%s575_s0 + $0x8] sm:$0xff]  ;;  %v52_v24 = vld [vmem:[%s575_s0 + $0x10] sm:$0xff] }
  0x9f   :  { %vm108_vm15 = vmand %vm84_vm8, %vm104_vm11  ;;  %v117_v25 = vsel %vm113_vm10, %v80_v21, 1073741824  ;;  %v150_v39 = vshra.s32 %v119_v34, 16  ;;  %v149_v62 = vand.u32 65535, %v119_v34 }
  0xa0   :  { %vm116_vm2 = vmand %vm108_vm15, %vm112_vm12  ;;  %v122_v26 = vshra.s32 %v117_v25, 16  ;;  %vm585_vm12 = vcmp.gt.s32.totalorder %v321_v13, %v313_v12  ;;  %v121_v53 = vand.u32 65535, %v117_v25  ;;  %v53_v25 = vld [vmem:[%s575_s0 + $0x18] sm:$0xff] }
  0xa1   :  { %vm106_vm5 = vmand %vm82_vm13, %vm102_vm14  ;;  %v481_v27 = vsel %vm116_vm2, %v80_v21, 1073741824  ;;  %v152_v45 = vcvt.s32.f32 %v150_v39  ;;  %v151_v4 = vcvt.s32.f32 %v149_v62 }
  0xa2   :  { %vm114_vm4 = vmand %vm106_vm5, %vm110_vm1  ;;  %v195_v28 = vpop.permute.xlu1 %194  ;;  %v192_v29 = vpop.permute.xlu0 %191  ;;  %v124_v30 = vcvt.s32.f32 %v122_v26  ;;  %v164_v31 = vshra.s32 %v481_v27, 16  ;;  %v123_v55 = vcvt.s32.f32 %v121_v53  ;;  %v163_v61 = vand.u32 65535, %v481_v27 }
  0xa3   :  { %vm203_vm6 = vcmp.le.s32.totalorder %v314_v19, %v195_v28  ;;  %vm211_vm9 = vcmp.lt.s32.totalorder %v195_v28, %v322_v20  ;;  %vm202_vm0 = vcmp.le.s32.totalorder %v313_v12, %v192_v29  ;;  %vm210_vm11 = vcmp.lt.s32.totalorder %v192_v29, %v321_v13 }
  0xa4   :  { %vm207_vm3 = vmand %vm82_vm13, %vm203_vm6  ;;  %125 = vmin.xlane.f32.xlu1 %v124_v30  ;;  %v118_v32 = vsel %vm114_vm4, %v80_v21, 1073741824  ;;  %v166_v33 = vcvt.s32.f32 %v164_v31  ;;  %vm586_vm13 = vcmp.gt.s32.totalorder %v463_v11, %v317_v10  ;;  %v165_v3 = vcvt.s32.f32 %v163_v61 }
  0xa5   :  { %vm215_vm10 = vmand %vm207_vm3, %vm211_vm9  ;;  %v136_v35 = vshra.s32 %v118_v32, 16  ;;  %v135_v57 = vand.u32 65535, %v118_v32 }
  0xa6   :  { %vm206_vm14 = vmand %vm585_vm12, %vm202_vm0  ;;  %v198_v36 = vpop.permute.xlu1 %197  ;;  %v201_v37 = vpop.permute.xlu0 %200  ;;  %v219_v38 = vsel %vm215_vm10, %v80_v21, 1073741824 }
  0xa7   :  { %vm214_vm15 = vmand %vm206_vm14, %vm210_vm11  ;;  %vm204_vm1 = vcmp.le.s32.totalorder %v317_v10, %v198_v36  ;;  %vm212_vm2 = vcmp.lt.s32.totalorder %v198_v36, %v463_v11  ;;  %vm205_vm5 = vcmp.le.s32.totalorder %v318_v15, %v201_v37  ;;  %vm213_vm6 = vcmp.lt.s32.totalorder %v201_v37, %v466_v16 }
  0xa8   :  { %vm208_vm4 = vmand %vm586_vm13, %vm204_vm1  ;;  %v138_v40 = vcvt.s32.f32 %v136_v35  ;;  %167 = vmin.xlane.f32.xlu1 %v166_v33  ;;  %v237_v41 = vshra.s32 %v219_v38, 16  ;;  %v218_v42 = vsel %vm214_vm15, %v80_v21, 1073741824  ;;  %v137_v60 = vcvt.s32.f32 %v135_v57 }
  0xa9   :  { %vm216_vm3 = vmand %vm208_vm4, %vm212_vm2  ;;  %v223_v44 = vshra.s32 %v218_v42, 16  ;;  %v236_v5 = vand.u32 65535, %v219_v38  ;;  %v222_v6 = vand.u32 65535, %v218_v42  ;;  %vm70_vm2 = vcmp.ne.s32.totalorder %v50_v22, 50259 }
  0xaa   :  { %vm209_vm0 = vmand %vm84_vm8, %vm205_vm5  ;;  %139 = vmin.xlane.f32.xlu0 %v138_v40  ;;  %v239_v43 = vcvt.s32.f32 %v237_v41  ;;  %v220_v48 = vsel %vm216_vm3, %v80_v21, 1073741824  ;;  %vm71_vm5 = vcmp.ne.s32.totalorder %v51_v23, 50259  ;;  %vm72_vm13 = vcmp.ne.s32.totalorder %v52_v24, 50259 }
  0xab   :  { %vm217_vm7 = vmand %vm209_vm0, %vm213_vm6  ;;  %v225_v49 = vcvt.s32.f32 %v223_v44  ;;  %v251_v51 = vshra.s32 %v220_v48, 16  ;;  %v238_v11 = vcvt.s32.f32 %v236_v5  ;;  %v224_v12 = vcvt.s32.f32 %v222_v6 }
  0xac   :  { %240 = vmin.xlane.f32.xlu1 %v239_v43  ;;  %v221_v46 = vsel %vm217_vm7, %v80_v21, 1073741824  ;;  %v250_v14 = vand.u32 65535, %v220_v48  ;;  %vm73_vm4 = vcmp.ne.s32.totalorder %v53_v25, 50259  ;;  %vm74_vm6 = vmpackc.low %vm71_vm5, %vm70_vm2 }
  0xad   :  { %v265_v47 = vshra.s32 %v221_v46, 16  ;;  %v253_v52 = vcvt.s32.f32 %v251_v51  ;;  %v264_v13 = vand.u32 65535, %v221_v46  ;;  %vm75_vm3 = vmpackc.low %vm73_vm4, %vm72_vm13 }
  0xae   :  { %153 = vmin.xlane.f32.xlu0 %v152_v45  ;;  %v252_v19 = vcvt.s32.f32 %v250_v14  ;;  %vm76_vm0 = vmpackc.even %vm75_vm3, %vm74_vm6 }
  0xaf   :  { %v267_v50 = vcvt.s32.f32 %v265_v47  ;;  %v266_v18 = vcvt.s32.f32 %v264_v13  ;;  %v77_v26 = vsel %vm76_vm0, 16843009, %v410_v0 }
  0xb0   :  { %78 = vst [vmem:[#allocation7] sm:$0xff] %v77_v26 }
  0xb1   :  { %268 = vmin.xlane.f32.xlu1 %v267_v50 }
  0xb2   :  { %226 = vmin.xlane.f32.xlu0 %v225_v49 }
  0xb6   :  { %254 = vmin.xlane.f32.xlu0 %v253_v52 }
 0x12d   :  { %v494_v54 = vpop.xlane.xlu1 %125 }
 0x12e   :  { %vm127_vm8 = vcmp.eq.f32.partialorder %v124_v30, %v494_v54 }
 0x12f   :  { %v128_v56 = vsel %vm127_vm8, %v123_v55, inf }
 0x130   :  { %129 = vmin.xlane.f32.xlu0 %v128_v56 }
 0x131   :  { %v497_v58 = vpop.xlane.xlu1 %167 }
 0x132   :  { %vm169_vm11 = vcmp.eq.f32.partialorder %v166_v33, %v497_v58 }
 0x133   :  { %v499_v59 = vpop.xlane.xlu0 %139  ;;  %v170_v7 = vsel %vm169_vm11, %v165_v3, inf }
 0x134   :  { %vm141_vm9 = vcmp.eq.f32.partialorder %v138_v40, %v499_v59 }
 0x135   :  { %v142_v63 = vsel %vm141_vm9, %v137_v60, inf  ;;  %v503_v1 = vpop.xlane.xlu1 %240 }
 0x136   :  { %143 = vmin.xlane.f32.xlu1 %v142_v63  ;;  %vm242_vm12 = vcmp.eq.f32.partialorder %v239_v43, %v503_v1 }
 0x137   :  { %v506_v2 = vpop.xlane.xlu0 %153  ;;  %v243_v15 = vsel %vm242_vm12, %v238_v11, inf }
 0x138   :  { %vm155_vm10 = vcmp.eq.f32.partialorder %v152_v45, %v506_v2 }
 0x139   :  { %v156_v8 = vsel %vm155_vm10, %v151_v4, inf }
 0x13a   :  { %171 = vmin.xlane.f32.xlu1 %v170_v7  ;;  %157 = vmin.xlane.f32.xlu0 %v156_v8  ;;  %v512_v10 = vpop.xlane.xlu1 %268 }
 0x13b   :  { %v510_v9 = vpop.xlane.xlu0 %226  ;;  %vm270_vm15 = vcmp.eq.f32.partialorder %v267_v50, %v512_v10 }
 0x13c   :  { %vm228_vm14 = vcmp.eq.f32.partialorder %v225_v49, %v510_v9  ;;  %v271_v20 = vsel %vm270_vm15, %v266_v18, inf }
 0x13d   :  { %v229_v16 = vsel %vm228_vm14, %v224_v12, inf }
 0x13e   :  { %244 = vmin.xlane.f32.xlu1 %v243_v15  ;;  %230 = vmin.xlane.f32.xlu0 %v229_v16 }
 0x13f   :  { %v516_v17 = vpop.xlane.xlu0 %254 }
 0x140   :  { %vm256_vm1 = vcmp.eq.f32.partialorder %v253_v52, %v516_v17 }
 0x141   :  { %v257_v21 = vsel %vm256_vm1, %v252_v19, inf }
 0x142   :  { %272 = vmin.xlane.f32.xlu1 %v271_v20  ;;  %258 = vmin.xlane.f32.xlu0 %v257_v21 }
 0x143   :  { %391 = shalt.err (!%p388_p0)
}
 0x144   :  { %300 = dma.vmem_to_hbm [thread:$0]  %s298_s19, 128, %s579_s4, [#allocation4]   ;;  %v132_v27 = vcvt.f32.s32 %v494_v54  ;;  %v146_v0 = vcvt.f32.s32 %v499_v59  ;;  %vm185_vm7 = vcmask 7168   ;;  %v174_v32 = vcvt.f32.s32 %v497_v58 }
 0x145   :  { %v160_v36 = vcvt.f32.s32 %v506_v2  ;;  %v247_v40 = vcvt.f32.s32 %v503_v1  ;;  %v233_v41 = vcvt.f32.s32 %v510_v9  ;;  %v275_v52 = vcvt.f32.s32 %v512_v10 }
 0x146   :  { %v133_v29 = vshll.u32 %v132_v27, 16  ;;  %v147_v35 = vshll.u32 %v146_v0, 16  ;;  %v175_v39 = vshll.u32 %v174_v32, 16  ;;  %v261_v53 = vcvt.f32.s32 %v516_v17 }
 0x147   :  { %v161_v44 = vshll.u32 %v160_v36, 16  ;;  %v248_v50 = vshll.u32 %v247_v40, 16  ;;  %v234_v51 = vshll.u32 %v233_v41, 16  ;;  %v276_v62 = vshll.u32 %v275_v52, 16 }
 0x148   :  { %v262_v63 = vshll.u32 %v261_v53, 16  ;;  %vm286_vm12 = vcmask 15368  }
 0x1b9   :  { %v130_v28 = vpop.xlane.xlu0 %129 }
 0x1ba   :  { %v131_v30 = vcvt.f32.s32 %v130_v28 }
 0x1bc   :  { %v134_v31 = vadd.s32 %v133_v29, %v131_v30 }
 0x1be   :  { %vm177_vm8 = vcmp.ge.s32.totalorder %v134_v31, 1073741824 }
 0x1bf   :  { %v181_v33 = vsel %vm177_vm8, 128, %v134_v31  ;;  %v144_v34 = vpop.xlane.xlu1 %143 }
 0x1c0   :  { %186 = vst.msk [vmem:[%s580_s5] sm:$0xff] %vm185_vm7, %v181_v33  ;;  %v145_v37 = vcvt.f32.s32 %v144_v34 }
 0x1c2   :  { %v148_v38 = vadd.s32 %v147_v35, %v145_v37 }
 0x1c3   :  { %v172_v42 = vpop.xlane.xlu1 %171  ;;  %v158_v43 = vpop.xlane.xlu0 %157 }
 0x1c4   :  { %vm178_vm9 = vcmp.ge.s32.totalorder %v148_v38, 1073741824  ;;  %v173_v45 = vcvt.f32.s32 %v172_v42  ;;  %v159_v46 = vcvt.f32.s32 %v158_v43 }
 0x1c5   :  { %v182_v47 = vsel %vm178_vm9, 128, %v148_v38 }
 0x1c6   :  { %187 = vst.msk [vmem:[%s580_s5 + $0x8] sm:$0xff] %vm185_vm7, %v182_v47  ;;  %v176_v48 = vadd.s32 %v175_v39, %v173_v45  ;;  %v162_v49 = vadd.s32 %v161_v44, %v159_v46 }
 0x1c7   :  { %v245_v54 = vpop.xlane.xlu1 %244  ;;  %v231_v55 = vpop.xlane.xlu0 %230 }
 0x1c8   :  { %vm180_vm11 = vcmp.ge.s32.totalorder %v176_v48, 1073741824  ;;  %vm179_vm10 = vcmp.ge.s32.totalorder %v162_v49, 1073741824  ;;  %v246_v56 = vcvt.f32.s32 %v245_v54  ;;  %v232_v57 = vcvt.f32.s32 %v231_v55 }
 0x1c9   :  { %v184_v58 = vsel %vm180_vm11, 128, %v176_v48  ;;  %v183_v59 = vsel %vm179_vm10, 128, %v162_v49 }
 0x1ca   :  { %189 = vst.msk [vmem:[%s580_s5 + $0x18] sm:$0xff] %vm185_vm7, %v184_v58  ;;  %188 = vst.msk [vmem:[%s580_s5 + $0x10] sm:$0xff] %vm185_vm7, %v183_v59  ;;  %v249_v60 = vadd.s32 %v248_v50, %v246_v56  ;;  %v235_v61 = vadd.s32 %v234_v51, %v232_v57 }
 0x1cb   :  { %v273_v1 = vpop.xlane.xlu1 %272  ;;  %v259_v2 = vpop.xlane.xlu0 %258 }
 0x1cc   :  { %vm279_vm14 = vcmp.ge.s32.totalorder %v249_v60, 1073741824  ;;  %vm278_vm15 = vcmp.ge.s32.totalorder %v235_v61, 1073741824  ;;  %v274_v3 = vcvt.f32.s32 %v273_v1  ;;  %v260_v4 = vcvt.f32.s32 %v259_v2 }
 0x1cd   :  { %v283_v5 = vsel %vm279_vm14, 128, %v249_v60  ;;  %v282_v6 = vsel %vm278_vm15, 128, %v235_v61 }
 0x1ce   :  { %288 = vst.msk [vmem:[%s580_s5 + $0x8] sm:$0xff] %vm286_vm12, %v283_v5  ;;  %287 = vst.msk [vmem:[%s580_s5] sm:$0xff] %vm286_vm12, %v282_v6  ;;  %v277_v7 = vadd.s32 %v276_v62, %v274_v3  ;;  %v263_v8 = vadd.s32 %v262_v63, %v260_v4 }
 0x1d0   :  { %vm281_vm1 = vcmp.ge.s32.totalorder %v277_v7, 1073741824  ;;  %vm280_vm2 = vcmp.ge.s32.totalorder %v263_v8, 1073741824 }
 0x1d1   :  { %v285_v9 = vsel %vm281_vm1, 128, %v277_v7  ;;  %v284_v10 = vsel %vm280_vm2, 128, %v263_v8 }
 0x1d2   :  { %290 = vst.msk [vmem:[%s580_s5 + $0x18] sm:$0xff] %vm286_vm12, %v285_v9  ;;  %289 = vst.msk [vmem:[%s580_s5 + $0x10] sm:$0xff] %vm286_vm12, %v284_v10 }
 0x1d3   :  { %404 = dma.done.wait [#allocation4], 128  }
 0x1d4   :  { %405 = vsyncadd [#allocation4], 4294967168 }
 0x1d5   :  { %308 = vsyncpa [#allocation3], 1 }
 0x1d6   :  { %309 = vsyncpa [#allocation6], 1 }
 0x1d7   :  { %310 = vsyncpa [#allocation4], 1 }

</bundles_post_ra>
